<compile_context>
chip_gen: v7x
topology: tpu7x:2x2x1
jax: 0.10.0
libtpu: 0.0.40
codegen_flags: <defaults>
</compile_context>

<pallas_src>
import functools

import jax
import jax.numpy as jnp
from jax.experimental import pallas as pl
from jax.experimental.pallas import tpu as pltpu

EPS = 1e-5
NEG_SLOPE = 0.1

C_IN = 1024
C_MID = 128
C_DISC = 10
C_MU = 2
C_VAR = 2
C_HEAD = C_DISC + C_MU + C_VAR      # 14
C_HEAD_PAD = 128                    # fused head weight padded to lane width

ROW_TILE = 512                      # rows per grid step for the tiled path


# ----------------------------------------------------------------------------
# Kernels
# ----------------------------------------------------------------------------
def _fused_kernel(x_ref, w1_ref, gbb_ref, wh_ref, disc_ref, mu_ref, var_ref):
    """Single-tile fast path: conv1 + BN(batch stats) + LeakyReLU + fused head.

    x_ref  : (N, 1024) bf16
    w1_ref : (1024, 128) bf16   conv1 weight (no bias)
    gbb_ref: (3, 128) f32       row0 gamma, row1 beta, row2 fused head bias
    wh_ref : (128, 128) bf16    fused [disc|mu|var|zero-pad] head weight
    """
    h = jnp.dot(x_ref[...], w1_ref[...], preferred_element_type=jnp.float32)

    inv_n = 1.0 / h.shape[0]
    s1 = jnp.sum(h, axis=0, keepdims=True)
    s2 = jnp.sum(h * h, axis=0, keepdims=True)
    mean = s1 * inv_n
    var = jnp.maximum(s2 * inv_n - mean * mean, 0.0)          # biased variance
    scale = gbb_ref[0:1, :] * jax.lax.rsqrt(var + EPS)
    shift = gbb_ref[1:2, :] - mean * scale

    y = h * scale + shift
    act = jnp.where(y >= 0.0, y, NEG_SLOPE * y)               # LeakyReLU(0.1)

    s = jnp.dot(act.astype(jnp.bfloat16), wh_ref[...],
                preferred_element_type=jnp.float32) + gbb_ref[2:3, :]

    disc_ref[...] = s[:, :C_DISC]
    mu_ref[...] = s[:, C_DISC:C_DISC + C_MU]
    var_ref[...] = jnp.exp(s[:, C_DISC + C_MU:C_HEAD])


def _stats_kernel(x_ref, w1_ref, gbb_ref, h_ref, ss_ref, *, inv_n):
    """Tiled phase 1: conv1 per row tile + global BN statistics.

    x_ref  : (TN, 1024) bf16    row tile of the flattened input
    w1_ref : (1024, 128) bf16   conv1 weight, VMEM-resident across the grid
    gbb_ref: (3, 128) f32       gamma / beta / fused head bias
    h_ref  : (TN, 128) bf16     conv1 activations (HBM intermediate)
    ss_ref : (3, 128) f32       accumulates (s1, s2); finalized to
                                (scale, shift, head-bias) on the last tile
    """
    i = pl.program_id(0)

    @pl.when(i == 0)
    def _():
        ss_ref[...] = jnp.zeros_like(ss_ref)

    h = jnp.dot(x_ref[...], w1_ref[...], preferred_element_type=jnp.float32)
    h_ref[...] = h.astype(jnp.bfloat16)

    ss_ref[0:1, :] += jnp.sum(h, axis=0, keepdims=True)
    ss_ref[1:2, :] += jnp.sum(h * h, axis=0, keepdims=True)

    @pl.when(i == pl.num_programs(0) - 1)
    def _():
        # Zero-padded rows added 0 to both sums; inv_n uses the true row count.
        mean = ss_ref[0:1, :] * inv_n
        var = jnp.maximum(ss_ref[1:2, :] * inv_n - mean * mean, 0.0)
        scale = gbb_ref[0:1, :] * jax.lax.rsqrt(var + EPS)
        ss_ref[0:1, :] = scale
        ss_ref[1:2, :] = gbb_ref[1:2, :] - mean * scale
        ss_ref[2:3, :] = gbb_ref[2:3, :]                       # head bias pass-through


def _head_kernel(h_ref, ss_ref, wh_ref, disc_ref, mu_ref, var_ref):
    """Tiled phase 2: normalize + LeakyReLU + fused head (row tiles independent).

    h_ref : (TN, 128) bf16      conv1 activations
    ss_ref: (3, 128) f32        scale / shift / head bias (resident)
    wh_ref: (128, 128) bf16     fused head weight (resident)
    """
    h = h_ref[...].astype(jnp.float32)
    y = h * ss_ref[0:1, :] + ss_ref[1:2, :]
    act = jnp.where(y >= 0.0, y, NEG_SLOPE * y)

    s = jnp.dot(act.astype(jnp.bfloat16), wh_ref[...],
                preferred_element_type=jnp.float32) + ss_ref[2:3, :]

    disc_ref[...] = s[:, :C_DISC]
    mu_ref[...] = s[:, C_DISC:C_DISC + C_MU]
    var_ref[...] = jnp.exp(s[:, C_DISC + C_MU:C_HEAD])


# ----------------------------------------------------------------------------
# Wrapper
# ----------------------------------------------------------------------------
def qhead_forward(x_nchw, params):
    """x_nchw: (B, 1024, 1, 1) float32.  Returns (disc_logits, mu, var)."""
    B, C, H, W = x_nchw.shape
    assert C == C_IN and H == 1 and W == 1

    # H = W = 1 -> NCHW flatten is a pure reshape.  Cast to bf16 in the
    # wrapper: halves the dominant HBM read; the MXU operand is bf16 anyway.
    x = x_nchw.reshape(B, C).astype(jnp.bfloat16)
    n = B

    w1 = params["w1"]          # (1024, 128) bf16
    wh = params["w_head"]      # (128, 128) bf16
    gbb = params["gbb"]        # (3, 128) f32: gamma / beta / fused head bias

    out_dtype = jnp.float32

    if n <= ROW_TILE:
        # --- single-launch fused path (small batch) -------------------------
        vmem = pl.BlockSpec(memory_space=pltpu.MemorySpace.VMEM)
        cost = pl.CostEstimate(
            flops=2 * n * C_IN * C_MID + 2 * n * C_MID * C_HEAD_PAD,
            transcendentals=n * C_VAR + C_MID,
            bytes_accessed=(n * C_IN * 2            # x (bf16)
                            + C_IN * C_MID * 2      # w1 (bf16)
                            + C_MID * C_HEAD_PAD * 2
                            + 3 * C_MID * 4
                            + n * C_HEAD * 4),      # three narrow outputs
        )
        disc, mu, var = pl.pallas_call(
            _fused_kernel,
            out_shape=(jax.ShapeDtypeStruct((n, C_DISC), out_dtype),
                       jax.ShapeDtypeStruct((n, C_MU), out_dtype),
                       jax.ShapeDtypeStruct((n, C_VAR), out_dtype)),
            in_specs=[vmem, vmem, vmem, vmem],
            out_specs=(vmem, vmem, vmem),
            cost_estimate=cost,
        )(x, w1, gbb, wh)
    else:
        # --- tiled two-phase path (large batch) ------------------------------
        tn = ROW_TILE
        n_pad = ((n + tn - 1) // tn) * tn
        if n_pad != n:
            # Zero rows contribute 0 to the BN sums; divided by the true n below.
            x = jnp.pad(x, ((0, n_pad - n), (0, 0)))
        grid = (n_pad // tn,)

        # Phase 1: conv1 + BN statistics.  Stats output accumulates across the
        # grid -> axis must be "arbitrary".
        # TODO(synk): on v7x, per-core partial (s1,s2) + CMEM reduce would let
        # this phase use both TensorCores as well.
        stats_cost = pl.CostEstimate(
            flops=2 * n_pad * C_IN * C_MID,
            transcendentals=C_MID,
            bytes_accessed=(n_pad * C_IN * 2 + C_IN * C_MID * 2
                            + 3 * C_MID * 4 + n_pad * C_MID * 2 + 3 * C_MID * 4),
        )
        h_bf16, ss = pl.pallas_call(
            functools.partial(_stats_kernel, inv_n=1.0 / n),
            grid_spec=pltpu.PrefetchScalarGridSpec(
                num_scalar_prefetch=0,
                grid=grid,
                in_specs=[
                    pl.BlockSpec((tn, C_IN), lambda i: (i, 0)),
                    pl.BlockSpec((C_IN, C_MID), lambda i: (0, 0)),     # resident
                    pl.BlockSpec((3, C_MID), lambda i: (0, 0)),        # resident
                ],
                out_specs=(
                    pl.BlockSpec((tn, C_MID), lambda i: (i, 0)),
                    pl.BlockSpec((3, C_MID), lambda i: (0, 0)),        # accumulator
                ),
            ),
            out_shape=(jax.ShapeDtypeStruct((n_pad, C_MID), jnp.bfloat16),
                       jax.ShapeDtypeStruct((3, C_MID), jnp.float32)),
            compiler_params=pltpu.CompilerParams(
                dimension_semantics=("arbitrary",)),
            cost_estimate=stats_cost,
        )(x, w1, gbb)

        # Phase 2: normalize + LeakyReLU + fused head.  Row tiles independent
        # -> "parallel" so both v7x TensorCores are used.
        head_cost = pl.CostEstimate(
            flops=2 * n_pad * C_MID * C_HEAD_PAD,
            transcendentals=n_pad * C_VAR,
            bytes_accessed=(n_pad * C_MID * 2 + 3 * C_MID * 4
                            + C_MID * C_HEAD_PAD * 2 + n_pad * C_HEAD * 4),
        )
        disc, mu, var = pl.pallas_call(
            _head_kernel,
            grid_spec=pltpu.PrefetchScalarGridSpec(
                num_scalar_prefetch=0,
                grid=grid,
                in_specs=[
                    pl.BlockSpec((tn, C_MID), lambda i: (i, 0)),
                    pl.BlockSpec((3, C_MID), lambda i: (0, 0)),        # resident
                    pl.BlockSpec((C_MID, C_HEAD_PAD), lambda i: (0, 0)),
                ],
                out_specs=(
                    pl.BlockSpec((tn, C_DISC), lambda i: (i, 0)),
                    pl.BlockSpec((tn, C_MU), lambda i: (i, 0)),
                    pl.BlockSpec((tn, C_VAR), lambda i: (i, 0)),
                ),
            ),
            out_shape=(jax.ShapeDtypeStruct((n_pad, C_DISC), out_dtype),
                       jax.ShapeDtypeStruct((n_pad, C_MU), out_dtype),
                       jax.ShapeDtypeStruct((n_pad, C_VAR), out_dtype)),
            compiler_params=pltpu.CompilerParams(
                dimension_semantics=("parallel",)),
            cost_estimate=head_cost,
        )(h_bf16, ss, wh)

        if n_pad != n:
            disc, mu, var = disc[:n], mu[:n], var[:n]

    if B == 1:
        # Match PyTorch's .squeeze() of (1, C_out, 1, 1) -> (C_out,).
        # (Note: PyTorch train-mode BatchNorm2d raises for a single value per
        #  channel, so B=1 is ill-defined for the reference module anyway.)
        disc, mu, var = disc[0], mu[0], var[0]
    return disc, mu, var


# ----------------------------------------------------------------------------
# Parameters (PyTorch layouts) + conversion to kernel layout + pure-JAX ref
# ----------------------------------------------------------------------------
def init_torch_params(key):
    """Deterministic synthetic parameters in PyTorch's native layouts."""
    ks = jax.random.split(key, 8)
    return dict(
        conv1_w=jax.random.normal(ks[0], (C_MID, C_IN, 1, 1), jnp.float32) * 0.02,
        bn_gamma=jax.random.normal(ks[1], (C_MID,), jnp.float32) * 0.1 + 1.0,
        bn_beta=jax.random.normal(ks[2], (C_MID,), jnp.float32) * 0.1,
        disc_w=jax.random.normal(ks[3], (C_DISC, C_MID, 1, 1), jnp.float32) * 0.05,
        disc_b=jax.random.normal(ks[4], (C_DISC,), jnp.float32) * 0.05,
        mu_w=jax.random.normal(ks[5], (C_MU, C_MID, 1, 1), jnp.float32) * 0.05,
        mu_b=jax.random.normal(ks[6], (C_MU,), jnp.float32) * 0.05,
        var_w=jax.random.normal(ks[7], (C_VAR, C_MID, 1, 1), jnp.float32) * 0.05,
        var_b=jnp.zeros((C_VAR,), jnp.float32),
    )


def prepare_params(tp):
    """Convert PyTorch (C_out, C_in, 1, 1) conv weights into the fused / packed
    bf16 matmul layout consumed by the kernels."""
    w1 = tp["conv1_w"][:, :, 0, 0].T                           # (1024, 128)
    wd = tp["disc_w"][:, :, 0, 0].T                            # (128, 10)
    wm = tp["mu_w"][:, :, 0, 0].T                              # (128, 2)
    wv = tp["var_w"][:, :, 0, 0].T                             # (128, 2)

    w_head = jnp.zeros((C_MID, C_HEAD_PAD), jnp.float32)
    w_head = w_head.at[:, :C_DISC].set(wd)
    w_head = w_head.at[:, C_DISC:C_DISC + C_MU].set(wm)
    w_head = w_head.at[:, C_DISC + C_MU:C_HEAD].set(wv)

    b_head = jnp.zeros((C_HEAD_PAD,), jnp.float32)
    b_head = b_head.at[:C_DISC].set(tp["disc_b"])
    b_head = b_head.at[C_DISC:C_DISC + C_MU].set(tp["mu_b"])
    b_head = b_head.at[C_DISC + C_MU:C_HEAD].set(tp["var_b"])

    gbb = jnp.stack([tp["bn_gamma"], tp["bn_beta"], b_head], axis=0)  # (3, 128)

    return dict(w1=w1.astype(jnp.bfloat16),
                w_head=w_head.astype(jnp.bfloat16),
                gbb=gbb.astype(jnp.float32))


def qhead_reference(x_nchw, tp):
    """Pure-JAX reference (PyTorch train-mode semantics, bf16 MXU operands
    mirrored so it tracks the kernel numerically)."""
    B = x_nchw.shape[0]
    x = x_nchw.reshape(B, C_IN)
    w1 = tp["conv1_w"][:, :, 0, 0].T
    h = jnp.dot(x.astype(jnp.bfloat16), w1.astype(jnp.bfloat16),
                preferred_element_type=jnp.float32)
    mean = jnp.mean(h, axis=0, keepdims=True)
    var = jnp.mean((h - mean) ** 2, axis=0, keepdims=True)     # biased (train mode)
    y = (h - mean) * jax.lax.rsqrt(var + EPS) * tp["bn_gamma"] + tp["bn_beta"]
    act = jnp.where(y >= 0.0, y, NEG_SLOPE * y)

    def head(w, b):
        return jnp.dot(act.astype(jnp.bfloat16),
                       w[:, :, 0, 0].T.astype(jnp.bfloat16),
                       preferred_element_type=jnp.float32) + b

    disc = head(tp["disc_w"], tp["disc_b"])
    mu = head(tp["mu_w"], tp["mu_b"])
    var_out = jnp.exp(head(tp["var_w"], tp["var_b"]))
    if B == 1:
        return disc[0], mu[0], var_out[0]
    return disc, mu, var_out


# ----------------------------------------------------------------------------
if __name__ == "__main__":
    key = jax.random.PRNGKey(0)
    k_small, k_large, k_p = jax.random.split(key, 3)

    torch_params = init_torch_params(k_p)
    params = prepare_params(torch_params)

    TOL = dict(atol=5e-2, rtol=5e-2)   # bf16 MXU operands + bf16 h intermediate

    # Small batch: typical InfoGAN QHead input -> single fused kernel launch.
    x_small = jax.random.normal(k_small, (2, C_IN, 1, 1), jnp.float32)
    disc, mu, var = qhead_forward(x_small, params)
    jax.block_until_ready((disc, mu, var))
    assert disc.shape == (2, C_DISC) and mu.shape == (2, C_MU) and var.shape == (2, C_VAR)
    rd, rm, rv = qhead_reference(x_small, torch_params)
    assert bool(jnp.allclose(disc, rd, **TOL))
    assert bool(jnp.allclose(mu, rm, **TOL))
    assert bool(jnp.allclose(var, rv, **TOL))
    assert bool(jnp.all(var > 0.0))          # exp() output must be positive

    # Larger batch: exercises the tiled two-phase (stats -> normalize+head)
    # path, including row padding (1600 -> 2048 rows, 4 tiles of 512).
    x_large = jax.random.normal(k_large, (1600, C_IN, 1, 1), jnp.float32)
    disc_l, mu_l, var_l = qhead_forward(x_large, params)
    jax.block_until_ready((disc_l, mu_l, var_l))
    assert disc_l.shape == (1600, C_DISC) and mu_l.shape == (1600, C_MU)
    rd, rm, rv = qhead_reference(x_large, torch_params)
    assert bool(jnp.allclose(disc_l, rd, **TOL))
    assert bool(jnp.allclose(mu_l, rm, **TOL))
    assert bool(jnp.allclose(var_l, rv, **TOL))
    assert bool(jnp.all(var_l > 0.0))

    print("KERNEL_OK")
</pallas_src>

<mosaic_0001>
module attributes {stable_mosaic.version = 11 : i64} {
  func.func @_fused_kernel(%arg0: memref<2x1024xbf16, #tpu.memory_space<vmem>>, %arg1: memref<1024x128xbf16, #tpu.memory_space<vmem>>, %arg2: memref<3x128xf32, #tpu.memory_space<vmem>>, %arg3: memref<128x128xbf16, #tpu.memory_space<vmem>>, %arg4: memref<2x10xf32, #tpu.memory_space<vmem>>, %arg5: memref<2x2xf32, #tpu.memory_space<vmem>>, %arg6: memref<2x2xf32, #tpu.memory_space<vmem>>) attributes {dimension_semantics = [], scalar_prefetch = 0 : i64, scratch_operands = 0 : i64, tpu.core_type = #tpu.core_type<tc>} {
    %c0 = arith.constant 0 : index
    %c0_0 = arith.constant 0 : index
    %0 = vector.load %arg0[%c0, %c0_0] : memref<2x1024xbf16, #tpu.memory_space<vmem>>, vector<2x1024xbf16>
    %c0_1 = arith.constant 0 : index
    %c0_2 = arith.constant 0 : index
    %1 = vector.load %arg1[%c0_1, %c0_2] : memref<1024x128xbf16, #tpu.memory_space<vmem>>, vector<1024x128xbf16>
    %cst = arith.constant dense<0.000000e+00> : vector<2x128xf32>
    %2 = tpu.matmul %0, %1, %cst {dimension_numbers = #tpu.dot_dimension_numbers<[1], [0], [0], [1], [0, 0, 1, 1], [], []>} : vector<2x1024xbf16>, vector<1024x128xbf16>, vector<2x128xf32> -> vector<2x128xf32>
    %cst_3 = arith.constant dense<0.000000e+00> : vector<128xf32>
    %3 = vector.multi_reduction <add>, %2, %cst_3 [0] : vector<2x128xf32> to vector<128xf32>
    %4 = vector.shape_cast %3 : vector<128xf32> to vector<1x128xf32>
    %5 = arith.mulf %2, %2 : vector<2x128xf32>
    %cst_4 = arith.constant dense<0.000000e+00> : vector<128xf32>
    %6 = vector.multi_reduction <add>, %5, %cst_4 [0] : vector<2x128xf32> to vector<128xf32>
    %7 = vector.shape_cast %6 : vector<128xf32> to vector<1x128xf32>
    %cst_5 = arith.constant 5.000000e-01 : f32
    %8 = vector.broadcast %cst_5 : f32 to vector<1x128xf32>
    %9 = arith.mulf %4, %8 : vector<1x128xf32>
    %cst_6 = arith.constant 5.000000e-01 : f32
    %10 = vector.broadcast %cst_6 : f32 to vector<1x128xf32>
    %11 = arith.mulf %7, %10 : vector<1x128xf32>
    %12 = arith.mulf %9, %9 : vector<1x128xf32>
    %13 = arith.subf %11, %12 : vector<1x128xf32>
    %cst_7 = arith.constant 0.000000e+00 : f32
    %14 = vector.broadcast %cst_7 : f32 to vector<1x128xf32>
    %15 = arith.maximumf %13, %14 : vector<1x128xf32>
    %c0_8 = arith.constant 0 : index
    %c0_9 = arith.constant 0 : index
    %16 = vector.load %arg2[%c0_8, %c0_9] : memref<3x128xf32, #tpu.memory_space<vmem>>, vector<1x128xf32>
    %cst_10 = arith.constant 9.99999974E-6 : f32
    %17 = vector.broadcast %cst_10 : f32 to vector<1x128xf32>
    %18 = arith.addf %15, %17 : vector<1x128xf32>
    %19 = math.rsqrt %18 : vector<1x128xf32>
    %20 = arith.mulf %16, %19 : vector<1x128xf32>
    %c1 = arith.constant 1 : index
    %c0_11 = arith.constant 0 : index
    %21 = vector.load %arg2[%c1, %c0_11] : memref<3x128xf32, #tpu.memory_space<vmem>>, vector<1x128xf32>
    %22 = arith.mulf %9, %20 : vector<1x128xf32>
    %23 = arith.subf %21, %22 : vector<1x128xf32>
    %24 = vector.broadcast %20 : vector<1x128xf32> to vector<2x128xf32>
    %25 = arith.mulf %2, %24 : vector<2x128xf32>
    %26 = vector.broadcast %23 : vector<1x128xf32> to vector<2x128xf32>
    %27 = arith.addf %25, %26 : vector<2x128xf32>
    %cst_12 = arith.constant 0.000000e+00 : f32
    %28 = vector.broadcast %cst_12 : f32 to vector<2x128xf32>
    %29 = arith.cmpf oge, %27, %28 : vector<2x128xf32>
    %cst_13 = arith.constant 1.000000e-01 : f32
    %30 = vector.broadcast %cst_13 : f32 to vector<2x128xf32>
    %31 = arith.mulf %30, %27 : vector<2x128xf32>
    %32 = arith.select %29, %27, %31 : vector<2x128xi1>, vector<2x128xf32>
    %33 = arith.truncf %32 : vector<2x128xf32> to vector<2x128xbf16>
    %c0_14 = arith.constant 0 : index
    %c0_15 = arith.constant 0 : index
    %34 = vector.load %arg3[%c0_14, %c0_15] : memref<128x128xbf16, #tpu.memory_space<vmem>>, vector<128x128xbf16>
    %cst_16 = arith.constant dense<0.000000e+00> : vector<2x128xf32>
    %35 = tpu.matmul %33, %34, %cst_16 {dimension_numbers = #tpu.dot_dimension_numbers<[1], [0], [0], [1], [0, 0, 1, 1], [], []>} : vector<2x128xbf16>, vector<128x128xbf16>, vector<2x128xf32> -> vector<2x128xf32>
    %c2 = arith.constant 2 : index
    %c0_17 = arith.constant 0 : index
    %36 = vector.load %arg2[%c2, %c0_17] : memref<3x128xf32, #tpu.memory_space<vmem>>, vector<1x128xf32>
    %37 = vector.broadcast %36 : vector<1x128xf32> to vector<2x128xf32>
    %38 = arith.addf %35, %37 : vector<2x128xf32>
    %39 = vector.extract_strided_slice %38 {offsets = [0, 0], sizes = [2, 10], strides = [1, 1]} : vector<2x128xf32> to vector<2x10xf32>
    %c0_18 = arith.constant 0 : index
    %c0_19 = arith.constant 0 : index
    %40 = vector.load %arg4[%c0_18, %c0_19] : memref<2x10xf32, #tpu.memory_space<vmem>>, vector<2x10xf32>
    tpu.vector_store %arg4[%c0_18, %c0_19], %39 {strides = array<i32>} : memref<2x10xf32, #tpu.memory_space<vmem>>, vector<2x10xf32>,
    %41 = vector.extract_strided_slice %38 {offsets = [0, 10], sizes = [2, 2], strides = [1, 1]} : vector<2x128xf32> to vector<2x2xf32>
    %c0_20 = arith.constant 0 : index
    %c0_21 = arith.constant 0 : index
    %42 = vector.load %arg5[%c0_20, %c0_21] : memref<2x2xf32, #tpu.memory_space<vmem>>, vector<2x2xf32>
    tpu.vector_store %arg5[%c0_20, %c0_21], %41 {strides = array<i32>} : memref<2x2xf32, #tpu.memory_space<vmem>>, vector<2x2xf32>,
    %43 = vector.extract_strided_slice %38 {offsets = [0, 12], sizes = [2, 2], strides = [1, 1]} : vector<2x128xf32> to vector<2x2xf32>
    %44 = math.exp %43 : vector<2x2xf32>
    %c0_22 = arith.constant 0 : index
    %c0_23 = arith.constant 0 : index
    %45 = vector.load %arg6[%c0_22, %c0_23] : memref<2x2xf32, #tpu.memory_space<vmem>>, vector<2x2xf32>
    tpu.vector_store %arg6[%c0_22, %c0_23], %44 {strides = array<i32>} : memref<2x2xf32, #tpu.memory_space<vmem>>, vector<2x2xf32>,
    return
  }
}

</mosaic_0001>

<bundles_post_ra>
// kernel: tpu_custom_call.1
= control target key start
LH: loop header
LB: loop body
LE: loop exit
PB: predicated region body
PF: predicated region fallthrough
CT: control target
= control target key end

     0   :  { %12 = vsyncpa [#allocation3], 0  ;;  %s1576_s0 = inlined_call_operand.hbm [shape: bf16[2,1024], index: 0, kind: input, shape index: {}]   ;;  %s1577_s1 = inlined_call_operand.hbm [shape: bf16[1024,128], index: 1, kind: input, shape index: {}]   ;;  %s1578_s2 = inlined_call_operand.vmem [shape: f32[3,128], index: 2, kind: input, shape index: {}]   ;;  %s1579_s3 = inlined_call_operand.hbm [shape: bf16[128,128], index: 3, kind: input, shape index: {}]   ;;  %s1580_s4 = inlined_call_operand.hbm [shape: f32[2,10], index: 4, kind: output, shape index: {0}]   ;;  %s1581_s5 = inlined_call_operand.hbm [shape: f32[2,2], index: 5, kind: output, shape index: {1}]   ;;  %s1582_s6 = inlined_call_operand.hbm [shape: f32[2,2], index: 6, kind: output, shape index: {2}]  }
   0x1   :  { %13 = vsyncpa [#allocation6], 0 }
   0x2   :  { %14 = vsyncpa [#allocation4], 0 }
   0x3   :  { %15 = vsyncpa [#allocation10], 0  ;;  %s1422_s21 = smov [#allocation5]   ;;  %s1282_s25 = scalar_lea.hbm %s1577_s1, 8192 }
   0x4   :  { %s31_s22 = sshll.u32 %s1422_s21, 4  ;;  %p1283_p0 = scmp.ne.s32.totalorder %s1577_s1, %s1282_s25  ;;  %s32_s22 = int_to_ptr.vmem [resolvable:$true] %s31_s22 }
   0x5   :  { %p1286_p1 = scmp.lt.u32.totalorder %s1282_s25, %s1577_s1 }
   0x7   :  { %p1288_p2 = pnand %p1286_p1, %p1283_p0 }
   0x9   :  { %1291 = shalt.err (!%p1288_p2)
}
   0xa   :  { %s1292_s30 = scalar_lea.vmem %s32_s22, 8192  ;;  %p1297_p4 = scmp.lt.s32.totalorder %s32_s22, %s32_s22 }
   0xb   :  { %p1293_p3 = scmp.ne.s32.totalorder %s32_s22, %s1292_s30  ;;  %p1298_p5 = scmp.lt.s32.totalorder %s1292_s30, %s1292_s30 }
   0xd   :  { %p1299_p6 = por %p1298_p5, %p1297_p4 }
   0xf   :  { %p1300_p7 = pnand %p1299_p6, %p1293_p3 }
  0x11   :  { %1303 = shalt.err (!%p1300_p7)
}
  0x12   :  { %s1423_s7 = smov 64   ;;  %s1424_s8 = smov 4  }
  0x13   :  { %37 = dma.hbm_to_vmem [thread:$0]  %s1577_s1, 8192, %s32_s22, [#allocation6], %s1423_s7, %s1423_s7, %s1424_s8  }
  0x14   :  { %s1425_s11 = smov [#allocation2]   ;;  %s1426_s13 = smov [#allocation7]  }
  0x15   :  { %s22_s12 = sshll.u32 %s1425_s11, 4  ;;  %s45_s14 = sshll.u32 %s1426_s13, 4  ;;  %s23_s12 = int_to_ptr.vmem [resolvable:$true] %s22_s12  ;;  %s46_s14 = int_to_ptr.vmem [resolvable:$true] %s45_s14 }
  0x16   :  { %s1304_s17 = scalar_lea.hbm %s1576_s0, 128 }
  0x17   :  { %p1305_p8 = scmp.ne.s32.totalorder %s1576_s0, %s1304_s17  ;;  %p1308_p9 = scmp.lt.u32.totalorder %s1304_s17, %s1576_s0 }
  0x19   :  { %p1310_p10 = pnand %p1308_p9, %p1305_p8 }
  0x1b   :  { %1313 = shalt.err (!%p1310_p10)
}
  0x1c   :  { %s1314_s1 = scalar_lea.vmem %s23_s12, 128  ;;  %p1319_p12 = scmp.lt.s32.totalorder %s23_s12, %s23_s12 }
  0x1d   :  { %p1315_p11 = scmp.ne.s32.totalorder %s23_s12, %s1314_s1  ;;  %p1320_p13 = scmp.lt.s32.totalorder %s1314_s1, %s1314_s1 }
  0x1f   :  { %p1321_p0 = por %p1320_p13, %p1319_p12 }
  0x21   :  { %p1322_p1 = pnand %p1321_p0, %p1315_p11 }
  0x23   :  { %1325 = shalt.err (!%p1322_p1)
}
  0x24   :  { %25 = dma.hbm_to_vmem [thread:$0]  %s1576_s0, 128, %s23_s12, [#allocation3]  }
  0x25   :  { %s1326_s26 = scalar_lea.hbm %s1579_s3, 1024 }
  0x26   :  { %p1327_p2 = scmp.ne.s32.totalorder %s1579_s3, %s1326_s26  ;;  %p1330_p3 = scmp.lt.u32.totalorder %s1326_s26, %s1579_s3 }
  0x28   :  { %p1332_p4 = pnand %p1330_p3, %p1327_p2 }
  0x2a   :  { %1335 = shalt.err (!%p1332_p4)
}
  0x2b   :  { %s1336_s9 = scalar_lea.vmem %s46_s14, 1024  ;;  %p1341_p6 = scmp.lt.s32.totalorder %s46_s14, %s46_s14 }
  0x2c   :  { %p1337_p5 = scmp.ne.s32.totalorder %s46_s14, %s1336_s9  ;;  %p1342_p7 = scmp.lt.s32.totalorder %s1336_s9, %s1336_s9 }
  0x2e   :  { %p1343_p8 = por %p1342_p7, %p1341_p6 }
  0x30   :  { %p1344_p9 = pnand %p1343_p8, %p1337_p5 }
  0x32   :  { %1347 = shalt.err (!%p1344_p9)
}
  0x33   :  { %51 = dma.hbm_to_vmem [thread:$0]  %s1579_s3, 1024, %s46_s14, [#allocation6], %s1423_s7, %s1423_s7, %s1424_s8  }
  0x34   :  { %1414 = dma.done.wait [#allocation3], 128  }
  0x35   :  { %1415 = vsyncadd [#allocation3], 4294967168 }
  0x36   :  { %1416 = dma.done.wait [#allocation6], 9216  }
  0x37   :  { %1417 = vsyncadd [#allocation6], 4294958080  ;;  %v1205_v0 = vld [vmem:[#allocation5 + $0x40] sm:$0xff]   ;;  %v1209_v4 = vld [vmem:[#allocation5 + $0x48] sm:$0xff]   ;;  %v1427_v22 = vmov 1966171168   ;;  %v196_v24 = vlaneseq }
  0x38   :  { %v1206_v1 = vld [vmem:[#allocation5 + $0xc0] sm:$0xff]   ;;  %1075 = vmatprep.subr.bf16.mxu0 %v1205_v0  ;;  %v1210_v5 = vld [vmem:[#allocation5 + $0xc8] sm:$0xff]   ;;  %v1213_v8 = vld [vmem:[#allocation5 + $0x50] sm:$0xff]   ;;  %v194_v23 = vunpack.c.l.s4 %v1427_v22  ;;  %vm1429_vm0 = vmmov 0   ;;  %vm793_vm1 = vcmask 1041408   ;;  %vm944_vm3 = vcmask 74752  }
  0x39   :  { %v1207_v2 = vld [vmem:[#allocation5] sm:$0xff]   ;;  %1097 = vmatprep.subr.bf16.mxu1 %v1206_v1  ;;  %v1211_v6 = vld [vmem:[#allocation5 + $0x8] sm:$0xff]   ;;  %v1214_v9 = vld [vmem:[#allocation5 + $0xd0] sm:$0xff]   ;;  %v1512_v30 = vshrl.u32 %v196_v24, 7  ;;  %s1430_s14 = smov 118   ;;  %s1431_s15 = smov [#allocation8]  }
  0x3a   :  { %v1208_v3 = vld [vmem:[#allocation5 + $0x80] sm:$0xff]   ;;  %1076 = vmatpush3.bf16.msra.mxu0 %v1207_v2  ;;  %v1212_v7 = vld [vmem:[#allocation5 + $0x88] sm:$0xff]   ;;  %v1215_v10 = vld [vmem:[#allocation5 + $0x10] sm:$0xff]   ;;  %v195_v29 = vunpack.c.0.s8 %v194_v23  ;;  %s965_s16 = sshll.u32 %s1431_s15, 4  ;;  %s966_s16 = int_to_ptr.vmem [resolvable:$true] %s965_s16 }
  0x3b   :  { %1098 = vmatpush3.bf16.msra.mxu1 %v1208_v3  ;;  %1077 = vmatprep.subr.bf16.mxu0 %v1209_v4  ;;  %v1216_v11 = vld [vmem:[#allocation5 + $0x90] sm:$0xff]   ;;  %v1217_v12 = vld [vmem:[#allocation5 + $0x58] sm:$0xff]   ;;  %v1221_v16 = vld [vmem:[#allocation5 + $0x60] sm:$0xff]   ;;  %s1348_s17 = scalar_lea.vmem %s966_s16, 32  ;;  %p1353_p11 = scmp.lt.s32.totalorder %s966_s16, %s966_s16 }
  0x3c   :  { %1099 = vmatprep.subr.bf16.mxu1 %v1210_v5  ;;  %v1218_v13 = vld [vmem:[#allocation5 + $0xd8] sm:$0xff]   ;;  %v1222_v17 = vld [vmem:[#allocation5 + $0xe0] sm:$0xff]   ;;  %v1225_v20 = vld [vmem:[#allocation5 + $0x68] sm:$0xff]   ;;  %v1515_v35 = vsub.s32 %v195_v29, %v1512_v30  ;;  %p1349_p10 = scmp.ne.s32.totalorder %s966_s16, %s1348_s17  ;;  %p1354_p12 = scmp.lt.s32.totalorder %s1348_s17, %s1348_s17 }
  0x3d   :  { %v1219_v14 = vld [vmem:[#allocation5 + $0x18] sm:$0xff]   ;;  %v1223_v18 = vld [vmem:[#allocation5 + $0x20] sm:$0xff]   ;;  %v1226_v21 = vld [vmem:[#allocation5 + $0xe8] sm:$0xff]  }
  0x3e   :  { %1078 = vmatpush3.bf16.msra.mxu0 %v1211_v6  ;;  %v1220_v15 = vld [vmem:[#allocation5 + $0x98] sm:$0xff]   ;;  %v1224_v19 = vld [vmem:[#allocation5 + $0xa0] sm:$0xff]   ;;  %v1227_v25 = vld [vmem:[#allocation5 + $0x28] sm:$0xff]   ;;  %p1355_p13 = por %p1354_p12, %p1353_p11 }
  0x3f   :  { %1100 = vmatpush3.bf16.msra.mxu1 %v1212_v7  ;;  %1079 = vmatprep.subr.bf16.mxu0 %v1213_v8  ;;  %v1228_v26 = vld [vmem:[#allocation5 + $0xa8] sm:$0xff]   ;;  %v1229_v27 = vld [vmem:[#allocation5 + $0x70] sm:$0xff]   ;;  %v1233_v33 = vld [vmem:[#allocation5 + $0x78] sm:$0xff]  }
  0x40   :  { %1101 = vmatprep.subr.bf16.mxu1 %v1214_v9  ;;  %v1230_v28 = vld [vmem:[#allocation5 + $0xf0] sm:$0xff]   ;;  %v1234_v34 = vld [vmem:[#allocation5 + $0xf8] sm:$0xff]   ;;  %v1238_v41 = vld [vmem:[#allocation5 + $0x140] sm:$0xff]   ;;  %p1356_p0 = pnand %p1355_p13, %p1349_p10 }
  0x41   :  { %v1231_v31 = vld [vmem:[#allocation5 + $0x30] sm:$0xff]   ;;  %v1235_v36 = vld [vmem:[#allocation5 + $0x38] sm:$0xff]   ;;  %v1239_v42 = vld [vmem:[#allocation5 + $0x1c0] sm:$0xff]  }
  0x42   :  { %1080 = vmatpush3.bf16.msra.mxu0 %v1215_v10  ;;  %v1232_v32 = vld [vmem:[#allocation5 + $0xb0] sm:$0xff]   ;;  %v1236_v37 = vld [vmem:[#allocation5 + $0xb8] sm:$0xff]   ;;  %v1240_v46 = vld [vmem:[#allocation5 + $0x100] sm:$0xff]  }
  0x43   :  { %1102 = vmatpush3.bf16.msra.mxu1 %v1216_v11  ;;  %1081 = vmatprep.subr.bf16.mxu0 %v1217_v12  ;;  %v62_v38 = vld [vmem:[#allocation2] sm:$0xff]  ;;  %v1241_v48 = vld [vmem:[#allocation5 + $0x180] sm:$0xff]   ;;  %v1242_v51 = vld [vmem:[#allocation5 + $0x148] sm:$0xff]  }
  0x44   :  { %1103 = vmatprep.subr.bf16.mxu1 %v1218_v13  ;;  %v192_v39 = vcombine.high %v62_v38, %v62_v38  ;;  %v199_v40 = vrot.slane %v62_v38, %v1515_v35  ;;  %v1243_v53 = vld [vmem:[#allocation5 + $0x1c8] sm:$0xff]   ;;  %v1246_v58 = vld [vmem:[#allocation5 + $0x150] sm:$0xff]   ;;  %v1250_v62 = vld [vmem:[#allocation5 + $0x158] sm:$0xff]  }
  0x45   :  { %v1244_v55 = vld [vmem:[#allocation5 + $0x108] sm:$0xff]   ;;  %v1247_v59 = vld [vmem:[#allocation5 + $0x1d0] sm:$0xff]   ;;  %v1251_v63 = vld [vmem:[#allocation5 + $0x1d8] sm:$0xff]  }
  0x46   :  { %1082 = vmatpush3.bf16.msra.mxu0 %v1219_v14  ;;  %v207_v43 = vcombine.high %v199_v40, %v199_v40  ;;  %v215_v44 = vrot.slane %v199_v40, %v1515_v35  ;;  %v1520_v45 = vrot.slane %v192_v39, %v1515_v35  ;;  %v1245_v56 = vld [vmem:[#allocation5 + $0x188] sm:$0xff]   ;;  %v1248_v60 = vld [vmem:[#allocation5 + $0x110] sm:$0xff]   ;;  %v1252_v0 = vld [vmem:[#allocation5 + $0x118] sm:$0xff]  }
  0x47   :  { %1104 = vmatpush3.bf16.msra.mxu1 %v1220_v15  ;;  %1083 = vmatprep.subr.bf16.mxu0 %v1221_v16  ;;  %v1249_v61 = vld [vmem:[#allocation5 + $0x190] sm:$0xff]   ;;  %v1253_v1 = vld [vmem:[#allocation5 + $0x198] sm:$0xff]   ;;  %v1254_v2 = vld [vmem:[#allocation5 + $0x160] sm:$0xff]  }
  0x48   :  { %1105 = vmatprep.subr.bf16.mxu1 %v1222_v17  ;;  %v229_v47 = vrot.slane %v207_v43, %v1515_v35  ;;  %v208_v49 = vcombine.high %v1520_v45, %v1520_v45  ;;  %v237_v50 = vcombine.high %v215_v44, %v215_v44  ;;  %v1255_v3 = vld [vmem:[#allocation5 + $0x1e0] sm:$0xff]   ;;  %v1258_v6 = vld [vmem:[#allocation5 + $0x168] sm:$0xff]   ;;  %v1262_v10 = vld [vmem:[#allocation5 + $0x170] sm:$0xff]  }
  0x49   :  { %v1256_v4 = vld [vmem:[#allocation5 + $0x120] sm:$0xff]   ;;  %v1259_v7 = vld [vmem:[#allocation5 + $0x1e8] sm:$0xff]   ;;  %v1263_v11 = vld [vmem:[#allocation5 + $0x1f0] sm:$0xff]  }
  0x4a   :  { %1084 = vmatpush3.bf16.msra.mxu0 %v1223_v18  ;;  %665 = vmatprep.mubr.bf16.mxu0 %v229_v47  ;;  %v239_v52 = vcombine.high %v229_v47, %v229_v47  ;;  %v236_v54 = vrot.slane %v208_v49, %v1515_v35  ;;  %v1257_v5 = vld [vmem:[#allocation5 + $0x1a0] sm:$0xff]   ;;  %v1260_v8 = vld [vmem:[#allocation5 + $0x128] sm:$0xff]   ;;  %v1264_v12 = vld [vmem:[#allocation5 + $0x130] sm:$0xff]   ;;  %v222_v18 = vrot.slane %v1520_v45, %v1515_v35 }
  0x4b   :  { %1106 = vmatpush3.bf16.msra.mxu1 %v1224_v19  ;;  %1085 = vmatprep.subr.bf16.mxu0 %v1225_v20  ;;  %v1261_v9 = vld [vmem:[#allocation5 + $0x1a8] sm:$0xff]   ;;  %v1265_v13 = vld [vmem:[#allocation5 + $0x1b0] sm:$0xff]   ;;  %v1266_v14 = vld [vmem:[#allocation5 + $0x178] sm:$0xff]  }
  0x4c   :  { %1107 = vmatprep.subr.bf16.mxu1 %v1226_v21  ;;  %705 = vmatprep.mubr.bf16.mxu1 %v239_v52  ;;  %v240_v57 = vcombine.high %v236_v54, %v236_v54  ;;  %v1267_v15 = vld [vmem:[#allocation5 + $0x1f8] sm:$0xff]   ;;  %v238_v19 = vcombine.high %v222_v18, %v222_v18  ;;  %v1270_v20 = vld [vmem:[#allocation7] sm:$0xff]   ;;  %v1428_v21 = vmov 0.0   ;;  %v1271_v22 = vld [vmem:[#allocation7 + $0x8] sm:$0xff]  }
  0x4d   :  { %v1268_v16 = vld [vmem:[#allocation5 + $0x138] sm:$0xff]   ;;  %v1272_v23 = vld [vmem:[#allocation7 + $0x10] sm:$0xff]  }
  0x4e   :  { %1086 = vmatpush3.bf16.msra.mxu0 %v1227_v25  ;;  %v1269_v17 = vld [vmem:[#allocation5 + $0x1b8] sm:$0xff]   ;;  %v1274_v25 = vld [vmem:[#allocation7 + $0x20] sm:$0xff]  }
  0x4f   :  { %1108 = vmatpush3.bf16.msra.mxu1 %v1228_v26  ;;  %1087 = vmatprep.subr.bf16.mxu0 %v1229_v27  ;;  %v1273_v24 = vld [vmem:[#allocation7 + $0x18] sm:$0xff]   ;;  %v1275_v26 = vld [vmem:[#allocation7 + $0x28] sm:$0xff]   ;;  %v1276_v27 = vld [vmem:[#allocation7 + $0x30] sm:$0xff]  }
  0x50   :  { %1109 = vmatprep.subr.bf16.mxu1 %v1230_v28  ;;  %v1277_v28 = vld [vmem:[#allocation7 + $0x38] sm:$0xff]  }
  0x52   :  { %1088 = vmatpush3.bf16.msra.mxu0 %v1231_v31 }
  0x53   :  { %1110 = vmatpush3.bf16.msra.mxu1 %v1232_v32  ;;  %1089 = vmatprep.subr.bf16.mxu0 %v1233_v33 }
  0x54   :  { %1111 = vmatprep.subr.bf16.mxu1 %v1234_v34 }
  0x56   :  { %1090 = vmatpush3.bf16.msra.mxu0 %v1235_v36 }
  0x57   :  { %1112 = vmatpush3.bf16.msra.mxu1 %v1236_v37  ;;  %1119 = vmatprep.subr.bf16.mxu0 %v1238_v41 }
  0x58   :  { %1141 = vmatprep.subr.bf16.mxu1 %v1239_v42 }
  0x59   :  { %666 = vmatmul.mubr.bf16.vlgmr.msra.gmra.mrb[0].mxu0 %v215_v44 }
  0x5a   :  { %1120 = vmatpush3.bf16.msra.mxu0 %v1240_v46  ;;  %706 = vmatmul.mubr.bf16.vlgmr.msra.gmra.mrb[0].mxu1 %v237_v50 }
  0x5b   :  { %1121 = vmatprep.subr.bf16.mxu0 %v1242_v51  ;;  %1142 = vmatpush3.bf16.msra.mxu1 %v1241_v48 }
  0x5c   :  { %745 = vmatprep.mubr.bf16.mxu0 %v236_v54  ;;  %1143 = vmatprep.subr.bf16.mxu1 %v1243_v53 }
  0x5d   :  { %785 = vmatprep.mubr.bf16.mxu1 %v240_v57 }
  0x5e   :  { %1122 = vmatpush3.bf16.msra.mxu0 %v1244_v55 }
  0x5f   :  { %1123 = vmatprep.subr.bf16.mxu0 %v1246_v58  ;;  %1144 = vmatpush3.bf16.msra.mxu1 %v1245_v56 }
  0x60   :  { %1145 = vmatprep.subr.bf16.mxu1 %v1247_v59 }
  0x62   :  { %1124 = vmatpush3.bf16.msra.mxu0 %v1248_v60 }
  0x63   :  { %1125 = vmatprep.subr.bf16.mxu0 %v1250_v62  ;;  %1146 = vmatpush3.bf16.msra.mxu1 %v1249_v61 }
  0x64   :  { %1147 = vmatprep.subr.bf16.mxu1 %v1251_v63 }
  0x66   :  { %1126 = vmatpush3.bf16.msra.mxu0 %v1252_v0 }
  0x67   :  { %1127 = vmatprep.subr.bf16.mxu0 %v1254_v2  ;;  %1148 = vmatpush3.bf16.msra.mxu1 %v1253_v1 }
  0x68   :  { %1149 = vmatprep.subr.bf16.mxu1 %v1255_v3 }
  0x6a   :  { %1128 = vmatpush3.bf16.msra.mxu0 %v1256_v4 }
  0x6b   :  { %1129 = vmatprep.subr.bf16.mxu0 %v1258_v6  ;;  %1150 = vmatpush3.bf16.msra.mxu1 %v1257_v5 }
  0x6c   :  { %1151 = vmatprep.subr.bf16.mxu1 %v1259_v7 }
  0x6e   :  { %1130 = vmatpush3.bf16.msra.mxu0 %v1260_v8 }
  0x6f   :  { %1131 = vmatprep.subr.bf16.mxu0 %v1262_v10  ;;  %1152 = vmatpush3.bf16.msra.mxu1 %v1261_v9  ;;  %v814_v10 = vld [vmem:[%s1578_s2] sm:$0x1] }
  0x70   :  { %1153 = vmatprep.subr.bf16.mxu1 %v1263_v11  ;;  %v823_v11 = vsub.s32 0, %v1512_v30  ;;  %v1066_v30 = vld [vmem:[%s1578_s2 + $0x2] ss:$0 sm:$0xff] }
  0x72   :  { %1132 = vmatpush3.bf16.msra.mxu0 %v1264_v12 }
  0x73   :  { %1133 = vmatprep.subr.bf16.mxu0 %v1266_v14  ;;  %1154 = vmatpush3.bf16.msra.mxu1 %v1265_v13  ;;  %v818_v14 = vld [vmem:[%s1578_s2 + $0x1] sm:$0x1] }
  0x74   :  { %1155 = vmatprep.subr.bf16.mxu1 %v1267_v15 }
  0x76   :  { %1134 = vmatpush3.bf16.msra.mxu0 %v1268_v16 }
  0x77   :  { %1156 = vmatpush3.bf16.msra.mxu1 %v1269_v17  ;;  %1172 = vmatprep.subr.bf16.mxu0 %v1428_v21 }
  0x79   :  { %746 = vmatmul.mubr.bf16.vlgmr.msra.gmra.mrb[4].mxu0 %v222_v18 }
  0x7a   :  { %786 = vmatmul.mubr.bf16.vlgmr.msra.gmra.mrb[4].mxu1 %v238_v19  ;;  %1173 = vmatpush3.bf16.msra.mxu0 %v1270_v20 }
  0x7b   :  { %1174 = vmatprep.subr.bf16.mxu0 %v1428_v21  ;;  %1188 = vmatprep.mubr.msk.bf16.mxu0 %vm1429_vm0, %v1428_v21 }
  0x7e   :  { %1175 = vmatpush3.bf16.msra.mxu0 %v1271_v22 }
  0x7f   :  { %1176 = vmatprep.subr.bf16.mxu0 %v1428_v21 }
  0x82   :  { %1177 = vmatpush3.bf16.msra.mxu0 %v1272_v23 }
  0x83   :  { %1178 = vmatprep.subr.bf16.mxu0 %v1428_v21 }
  0x86   :  { %1179 = vmatpush3.bf16.msra.mxu0 %v1273_v24 }
  0x87   :  { %1180 = vmatprep.subr.bf16.mxu0 %v1428_v21 }
  0x8a   :  { %1181 = vmatpush3.bf16.msra.mxu0 %v1274_v25 }
  0x8b   :  { %1182 = vmatprep.subr.bf16.mxu0 %v1428_v21 }
  0x8e   :  { %1183 = vmatpush3.bf16.msra.mxu0 %v1275_v26 }
  0x8f   :  { %1184 = vmatprep.subr.bf16.mxu0 %v1428_v21 }
  0x92   :  { %1185 = vmatpush3.bf16.msra.mxu0 %v1276_v27 }
  0x93   :  { %1186 = vmatprep.subr.bf16.mxu0 %v1428_v21 }
  0x96   :  { %1187 = vmatpush3.bf16.msra.mxu0 %v1277_v28 }
 0x12c   :  { %v1091_v29 = vpop.f32.mrb[0].mxu0 }
 0x12d   :  { %v1092_v31 = vpop.f32.mrb[1].mxu0  ;;  %v1113_v32 = vpop.f32.mrb[0].mxu1 }
 0x12e   :  { %v1093_v33 = vadd.f32 %v1092_v31, %v1091_v29  ;;  %v1094_v34 = vpop.f32.mrb[2].mxu0  ;;  %v1114_v35 = vpop.f32.mrb[1].mxu1 }
 0x12f   :  { %v1095_v36 = vpop.f32.mrb[3].mxu0  ;;  %v1115_v37 = vadd.f32 %v1114_v35, %v1113_v32  ;;  %v1116_v38 = vpop.f32.mrb[2].mxu1 }
 0x130   :  { %v1117_v39 = vpop.f32.mrb[3].mxu1 }
 0x131   :  { %v708_v40 = vadd.f32 %v1115_v37, %v1093_v33 }
 0x14c   :  { %v1135_v41 = vpop.f32.mrb[4].mxu0 }
 0x14d   :  { %v1136_v42 = vpop.f32.mrb[5].mxu0  ;;  %v1157_v43 = vpop.f32.mrb[4].mxu1 }
 0x14e   :  { %v1137_v44 = vadd.f32 %v1136_v42, %v1135_v41  ;;  %v1138_v45 = vpop.f32.mrb[6].mxu0  ;;  %v1158_v46 = vpop.f32.mrb[5].mxu1 }
 0x14f   :  { %v1139_v47 = vpop.f32.mrb[7].mxu0  ;;  %v1159_v49 = vadd.f32 %v1158_v46, %v1157_v43  ;;  %v1160_v50 = vpop.f32.mrb[6].mxu1 }
 0x150   :  { %v748_v48 = vadd.f32 %v1137_v44, %v708_v40  ;;  %v1161_v51 = vpop.f32.mrb[7].mxu1 }
 0x152   :  { %v788_v52 = vadd.f32 %v1159_v49, %v748_v48 }
 0x154   :  { %v794_v53 = vsel %vm793_vm1, %v788_v52, 0.0  ;;  %v801_v54 = vmul.f32 %v788_v52, %v788_v52 }
 0x155   :  { %v795_v55 = vrot.slane %v794_v53, 4 }
 0x156   :  { %v802_v56 = vsel %vm793_vm1, %v801_v54, 0.0 }
 0x157   :  { %v796_v57 = vadd.f32 %v795_v55, %v794_v53  ;;  %v803_v58 = vrot.slane %v802_v56, 4 }
 0x159   :  { %v797_v59 = vrot.slane %v796_v57, 2  ;;  %v804_v60 = vadd.f32 %v803_v58, %v802_v56 }
 0x15b   :  { %v798_v61 = vadd.f32 %v797_v59, %v796_v57  ;;  %v805_v62 = vrot.slane %v804_v60, 2 }
 0x15d   :  { %v799_v63 = vrot.slane %v798_v61, 1  ;;  %v806_v0 = vadd.f32 %v805_v62, %v804_v60 }
 0x15f   :  { %v800_v1 = vadd.f32 %v799_v63, %v798_v61  ;;  %v807_v2 = vrot.slane %v806_v0, 1 }
 0x161   :  { %v808_v3 = vadd.f32 %v807_v2, %v806_v0  ;;  %v809_v4 = vmul.f32 0.5, %v800_v1 }
 0x163   :  { %v810_v5 = vmul.f32 0.5, %v808_v3  ;;  %v811_v6 = vmul.f32 %v809_v4, %v809_v4 }
 0x165   :  { %v812_v7 = vsub.f32 %v810_v5, %v811_v6 }
 0x167   :  { %v813_v8 = vmax.f32 %v812_v7, 0.0 }
 0x169   :  { %v815_v9 = vadd.f32 1e-05, %v813_v8 }
 0x16b   :  { %1278 = vrsqrt.f32 %v815_v9 }
 0x175   :  { %v1279_v12 = vpop.eup %1278 }
 0x176   :  { %v817_v13 = vmul.f32 %v1279_v12, %v814_v10 }
 0x178   :  { %v819_v15 = vmul.f32 %v817_v13, %v809_v4  ;;  %v824_v16 = vrot.slane %v817_v13, %v823_v11 }
 0x17a   :  { %v820_v17 = vsub.f32 %v818_v14, %v819_v15  ;;  %v825_v18 = vmul.f32 %v824_v16, %v788_v52 }
 0x17c   :  { %v829_v19 = vrot.slane %v820_v17, %v823_v11 }
 0x17e   :  { %v830_v20 = vadd.f32 %v829_v19, %v825_v18 }
 0x180   :  { %vm831_vm2 = vcmp.ge.f32.partialorder %v830_v20, 0.0  ;;  %v832_v21 = vmul.f32 0.1, %v830_v20 }
 0x182   :  { %v833_v22 = vsel %vm831_vm2, %v830_v20, %v832_v21 }
 0x183   :  { %v834_v23 = vpack.c.bf16 %v833_v22, %v833_v22 }
 0x185   :  { %1189 = vmatmul.mubr.bf16.vlgmr.msra.gmra.mrb[8].mxu0 %v834_v23 }
 0x258   :  { %v938_v24 = vpop.f32.mrb[8].mxu0 }
 0x259   :  { %v939_v25 = vadd.f32 %v1066_v30, %v938_v24  ;;  %v1190_v26 = vpop.f32.mrb[9].mxu0 }
 0x25a   :  { %v941_v27 = vpop.f32.mrb[10].mxu0 }
 0x25b   :  { %v952_v28 = vmul.f32 1.442695, %v939_v25  ;;  %947 = vrot.lane.b32.xlu0 %v939_v25, %s1430_s14  ;;  %v1191_v29 = vpop.f32.mrb[11].mxu0  ;;  %945 = vst.msk [vmem:[#allocation8] sm:$0x3] %vm944_vm3, %v939_v25 }
 0x25d   :  { %1280 = vpow2.f32 %v952_v28 }
 0x25e   :  { %1359 = shalt.err (!%p1356_p0)
}
 0x25f   :  { %s1360_s19 = scalar_lea.hbm %s1580_s4, 32 }
 0x260   :  { %p1361_p1 = scmp.ne.s32.totalorder %s1580_s4, %s1360_s19  ;;  %p1364_p2 = scmp.lt.u32.totalorder %s1360_s19, %s1580_s4 }
 0x262   :  { %p1366_p3 = pnand %p1364_p2, %p1361_p1 }
 0x264   :  { %1369 = shalt.err (!%p1366_p3)
}
 0x265   :  { %968 = dma.vmem_to_hbm [thread:$0]  %s966_s16, 32, %s1580_s4, [#allocation4]   ;;  %vm950_vm4 = vcmask 9216  }
 0x266   :  { %s1432_s25 = smov 116   ;;  %s1433_s26 = smov [#allocation9]  }
 0x267   :  { %v1281_v31 = vpop.eup %1280  ;;  %s975_s27 = sshll.u32 %s1433_s26, 4  ;;  %s976_s27 = int_to_ptr.vmem [resolvable:$true] %s975_s27 }
 0x268   :  { %955 = vrot.lane.b32.xlu0 %v1281_v31, %s1432_s25  ;;  %s1370_s28 = scalar_lea.vmem %s976_s27, 32  ;;  %p1375_p5 = scmp.lt.s32.totalorder %s976_s27, %s976_s27 }
 0x269   :  { %p1371_p4 = scmp.ne.s32.totalorder %s976_s27, %s1370_s28  ;;  %p1376_p6 = scmp.lt.s32.totalorder %s1370_s28, %s1370_s28 }
 0x26b   :  { %p1377_p7 = por %p1376_p6, %p1375_p5 }
 0x26d   :  { %p1378_p8 = pnand %p1377_p7, %p1371_p4 }
 0x2cd   :  { %v948_v32 = vpop.permute.xlu0 %947 }
 0x2ce   :  { %951 = vst.msk [vmem:[#allocation9] sm:$0x3] %vm950_vm4, %v948_v32 }
 0x2cf   :  { %1381 = shalt.err (!%p1378_p8)
}
 0x2d0   :  { %s1382_s4 = scalar_lea.hbm %s1581_s5, 32 }
 0x2d1   :  { %p1383_p9 = scmp.ne.s32.totalorder %s1581_s5, %s1382_s4  ;;  %p1386_p10 = scmp.lt.u32.totalorder %s1382_s4, %s1581_s5 }
 0x2d3   :  { %p1388_p11 = pnand %p1386_p10, %p1383_p9 }
 0x2d5   :  { %1391 = shalt.err (!%p1388_p11)
}
 0x2d6   :  { %978 = dma.vmem_to_hbm [thread:$0]  %s976_s27, 32, %s1581_s5, [#allocation10]  }
 0x2d7   :  { %s1434_s11 = smov [#allocation11]  }
 0x2d8   :  { %s985_s12 = sshll.u32 %s1434_s11, 4  ;;  %s986_s12 = int_to_ptr.vmem [resolvable:$true] %s985_s12 }
 0x2d9   :  { %s1392_s13 = scalar_lea.vmem %s986_s12, 32  ;;  %p1397_p13 = scmp.lt.s32.totalorder %s986_s12, %s986_s12 }
 0x2da   :  { %v956_v33 = vpop.permute.xlu0 %955  ;;  %p1393_p12 = scmp.ne.s32.totalorder %s986_s12, %s1392_s13  ;;  %p1398_p0 = scmp.lt.s32.totalorder %s1392_s13, %s1392_s13 }
 0x2db   :  { %958 = vst.msk [vmem:[#allocation11] sm:$0x3] %vm950_vm4, %v956_v33 }
 0x2dc   :  { %p1399_p1 = por %p1398_p0, %p1397_p13 }
 0x2de   :  { %p1400_p2 = pnand %p1399_p1, %p1393_p12 }
 0x2e0   :  { %1403 = shalt.err (!%p1400_p2)
}
 0x2e1   :  { %s1404_s16 = scalar_lea.hbm %s1582_s6, 32 }
 0x2e2   :  { %p1405_p3 = scmp.ne.s32.totalorder %s1582_s6, %s1404_s16  ;;  %p1408_p4 = scmp.lt.u32.totalorder %s1404_s16, %s1582_s6 }
 0x2e4   :  { %p1410_p5 = pnand %p1408_p4, %p1405_p3 }
 0x2e6   :  { %1413 = shalt.err (!%p1410_p5)
}
 0x2e7   :  { %988 = dma.vmem_to_hbm [thread:$0]  %s986_s12, 32, %s1582_s6, [#allocation10]  }
 0x2e8   :  { %1418 = dma.done.wait [#allocation4], 32  }
 0x2e9   :  { %1419 = vsyncadd [#allocation4], 4294967264 }
 0x2ea   :  { %1420 = dma.done.wait [#allocation10], 64  }
 0x2eb   :  { %1421 = vsyncadd [#allocation10], 4294967232 }
 0x2ec   :  { %998 = vsyncpa [#allocation3], 1 }
 0x2ed   :  { %999 = vsyncpa [#allocation6], 1 }
 0x2ee   :  { %1000 = vsyncpa [#allocation4], 1 }
 0x2ef   :  { %1001 = vsyncpa [#allocation10], 1 }

</bundles_post_ra>
